<compile_context>
chip_gen: v5e
topology: v5e:2x2
jax: 0.10.0
libtpu: 0.0.40
codegen_flags: <defaults>
</compile_context>

<pallas_src>
import functools

import jax
import jax.numpy as jnp
from jax.experimental import pallas as pl
from jax.experimental.pallas import tpu as pltpu


def _bilinear_matrix(n_in: int, scale: int = 2) -> jnp.ndarray:
    """Interpolation matrix A (n_out, n_in) reproducing PyTorch nn.Upsample
    (mode='bilinear', align_corners=False) along one axis: out = A @ in."""
    n_out = n_in * scale
    dst = jnp.arange(n_out, dtype=jnp.float32)
    src = (dst + 0.5) / float(scale) - 0.5
    src = jnp.maximum(src, 0.0)                      # PyTorch clamps negative src
    i0 = jnp.floor(src).astype(jnp.int32)
    i0 = jnp.clip(i0, 0, n_in - 1)
    i1 = jnp.minimum(i0 + 1, n_in - 1)
    lam = src - i0.astype(jnp.float32)
    rows = jnp.arange(n_out)
    a = jnp.zeros((n_out, n_in), dtype=jnp.float32)
    a = a.at[rows, i0].add(1.0 - lam)
    a = a.at[rows, i1].add(lam)
    return a


def _confident_block_kernel(x_ref, w1_ref, w2_ref, kt_ref, o_ref):
    # x_ref block: (Bt, C, HW)   o_ref block: (Bt, C, 4*HW)
    x = x_ref[...].astype(jnp.float32)
    bt, c, hw = x.shape

    # --- SELayer ---
    # Global average pool over the flattened spatial axis: full-width lane
    # reduction (XLU), result (Bt, C).
    y = jnp.mean(x, axis=2)
    # fc1 (no bias) + ReLU, fc2 (no bias) + Sigmoid.
    h = jnp.maximum(
        jnp.dot(y, w1_ref[...], preferred_element_type=jnp.float32), 0.0)
    s = jax.nn.sigmoid(
        jnp.dot(h, w2_ref[...], preferred_element_type=jnp.float32))     # (Bt, C)
    # Lane-dense broadcast multiply.
    scaled = x * s[:, :, None]                                           # (Bt, C, HW)

    # --- bilinear 2x upsample as one matmul with the Kronecker matrix ---
    # (Bt*C, HW) @ (HW, 4HW) -> (Bt*C, 4HW); leading-dim merge/split reshapes
    # leave the lane layout untouched.
    out = jnp.dot(scaled.reshape(bt * c, hw), kt_ref[...],
                  preferred_element_type=jnp.float32)
    o_ref[...] = out.reshape(bt, c, 4 * hw).astype(o_ref.dtype)


def _choose_bt(B: int, C: int, HW: int) -> int:
    """Batch elements per grid step: amortize step overhead while keeping
    double-buffered blocks comfortably inside VMEM (incl. v7x's 64 MiB) and
    >=2 grid steps when B >= 2 so both v7x TensorCores get work."""
    bytes_per_elem = C * HW * 4 * (1 + 4)          # f32 input tile + f32 output tile
    vmem_budget = 12 << 20                         # leaves room for 2x buffering + f32 temps
    cap = max(1, vmem_budget // (2 * bytes_per_elem))
    if B <= 1:
        return 1
    return max(1, min(cap, pl.cdiv(B, 2)))


@jax.jit
def confident_block(x, w1t, w2t):
    """x: (B, C, H, W) float32.  w1t: (C, C//4), w2t: (C//4, C)  (already
    transposed so that y @ w1t matches PyTorch Linear(y))."""
    B, C, H, W = x.shape
    Cr = w1t.shape[1]
    HW = H * W

    ah = _bilinear_matrix(H, 2)                    # (2H, H)
    aw = _bilinear_matrix(W, 2)                    # (2W, W)
    # kron(ah, aw): (4HW, HW); row i = oh*2W + ow, col j = h*W + w.
    kt = jnp.kron(ah, aw).T                        # (HW, 4HW), ~1 MiB for H=W=16

    bt = _choose_bt(B, C, HW)
    grid = (pl.cdiv(B, bt),)

    x_flat = x.reshape(B, C, HW)                   # contiguous, free

    out_flat = pl.pallas_call(
        _confident_block_kernel,
        out_shape=jax.ShapeDtypeStruct((B, C, 4 * HW), x.dtype),
        grid_spec=pltpu.PrefetchScalarGridSpec(
            num_scalar_prefetch=0,
            grid=grid,
            in_specs=[
                pl.BlockSpec((bt, C, HW), lambda b: (b, 0, 0)),
                pl.BlockSpec((C, Cr), lambda b: (0, 0)),      # constant -> fetched once
                pl.BlockSpec((Cr, C), lambda b: (0, 0)),
                pl.BlockSpec((HW, 4 * HW), lambda b: (0, 0)),
            ],
            out_specs=pl.BlockSpec((bt, C, 4 * HW), lambda b: (b, 0, 0)),
        ),
        compiler_params=pltpu.CompilerParams(
            dimension_semantics=("parallel",)),
    )(x_flat, w1t, w2t, kt)

    return out_flat.reshape(B, C, 2 * H, 2 * W)    # contiguous, free


def _reference(x, w1t, w2t):
    """Pure-JAX reference of confidentBlock (SE + bilinear 2x upsample)."""
    B, C, H, W = x.shape
    y = x.mean(axis=(2, 3))
    y = jnp.maximum(y @ w1t, 0.0)
    y = jax.nn.sigmoid(y @ w2t)
    xs = x * y[:, :, None, None]

    def axis_idx(n_in):
        dst = jnp.arange(2 * n_in, dtype=jnp.float32)
        src = jnp.maximum((dst + 0.5) / 2.0 - 0.5, 0.0)
        i0 = jnp.clip(jnp.floor(src).astype(jnp.int32), 0, n_in - 1)
        i1 = jnp.minimum(i0 + 1, n_in - 1)
        lam = src - i0.astype(jnp.float32)
        return i0, i1, lam

    i0h, i1h, lh = axis_idx(H)
    i0w, i1w, lw = axis_idx(W)
    up_h = (xs[:, :, i0h, :] * (1.0 - lh)[None, None, :, None]
            + xs[:, :, i1h, :] * lh[None, None, :, None])
    out = (up_h[:, :, :, i0w] * (1.0 - lw)[None, None, None, :]
           + up_h[:, :, :, i1w] * lw[None, None, None, :])
    return out


if __name__ == "__main__":
    B, C, H, W = 2, 32, 16, 16      # channels=32 as in confidentBlock default
    Cr = C // 4

    key = jax.random.PRNGKey(0)
    kx, k1, k2 = jax.random.split(key, 3)
    x = jax.random.normal(kx, (B, C, H, W), dtype=jnp.float32)
    # PyTorch Linear weights are (out, in); we pass their transposes.
    w1 = jax.random.normal(k1, (Cr, C), dtype=jnp.float32) * (1.0 / jnp.sqrt(C))
    w2 = jax.random.normal(k2, (C, Cr), dtype=jnp.float32) * (1.0 / jnp.sqrt(Cr))
    w1t = w1.T   # (C, Cr)
    w2t = w2.T   # (Cr, C)

    out = confident_block(x, w1t, w2t)
    out = jax.block_until_ready(out)

    ref = _reference(x, w1t, w2t)
    assert out.shape == (B, C, 2 * H, 2 * W), out.shape
    assert jnp.allclose(out, ref, atol=1e-5, rtol=1e-5), (
        float(jnp.max(jnp.abs(out - ref))))

    print("KERNEL_OK")
</pallas_src>

<mosaic_0001>
module attributes {stable_mosaic.version = 11 : i64} {
  func.func @_confident_block_kernel(%arg0: i32, %arg1: memref<1x32x256xf32, #tpu.memory_space<vmem>>, %arg2: memref<32x8xf32, #tpu.memory_space<vmem>>, %arg3: memref<8x32xf32, #tpu.memory_space<vmem>>, %arg4: memref<256x1024xf32, #tpu.memory_space<vmem>>, %arg5: memref<1x32x1024xf32, #tpu.memory_space<vmem>>) attributes {dimension_semantics = [#tpu.dimension_semantics<parallel>], iteration_bounds = array<i64: 2>, scalar_prefetch = 0 : i64, scratch_operands = 0 : i64, tpu.core_type = #tpu.core_type<tc>, window_params = [{transform_indices = @transform_0, window_bounds = array<i64: 1, 32, 256>}, {pipeline_mode = #tpu.pipeline_mode<synchronous>, transform_indices = @transform_1, window_bounds = array<i64: 32, 8>}, {pipeline_mode = #tpu.pipeline_mode<synchronous>, transform_indices = @transform_2, window_bounds = array<i64: 8, 32>}, {pipeline_mode = #tpu.pipeline_mode<synchronous>, transform_indices = @transform_3, window_bounds = array<i64: 256, 1024>}, {transform_indices = @transform_4, window_bounds = array<i64: 1, 32, 1024>}]} {
    %c0 = arith.constant 0 : index
    %c0_0 = arith.constant 0 : index
    %c0_1 = arith.constant 0 : index
    %0 = vector.load %arg1[%c0, %c0_0, %c0_1] : memref<1x32x256xf32, #tpu.memory_space<vmem>>, vector<1x32x256xf32>
    %cst = arith.constant dense<0.000000e+00> : vector<1x32xf32>
    %1 = vector.multi_reduction <add>, %0, %cst [2] : vector<1x32x256xf32> to vector<1x32xf32>
    %cst_2 = arith.constant 2.560000e+02 : f32
    %2 = vector.broadcast %cst_2 : f32 to vector<1x32xf32>
    %3 = arith.divf %1, %2 : vector<1x32xf32>
    %c0_3 = arith.constant 0 : index
    %c0_4 = arith.constant 0 : index
    %4 = vector.load %arg2[%c0_3, %c0_4] : memref<32x8xf32, #tpu.memory_space<vmem>>, vector<32x8xf32>
    %cst_5 = arith.constant dense<0.000000e+00> : vector<1x8xf32>
    %5 = tpu.matmul %3, %4, %cst_5 {dimension_numbers = #tpu.dot_dimension_numbers<[1], [0], [0], [1], [0, 0, 1, 1], [], []>} : vector<1x32xf32>, vector<32x8xf32>, vector<1x8xf32> -> vector<1x8xf32>
    %cst_6 = arith.constant 0.000000e+00 : f32
    %6 = vector.broadcast %cst_6 : f32 to vector<1x8xf32>
    %7 = arith.maximumf %5, %6 : vector<1x8xf32>
    %c0_7 = arith.constant 0 : index
    %c0_8 = arith.constant 0 : index
    %8 = vector.load %arg3[%c0_7, %c0_8] : memref<8x32xf32, #tpu.memory_space<vmem>>, vector<8x32xf32>
    %cst_9 = arith.constant dense<0.000000e+00> : vector<1x32xf32>
    %9 = tpu.matmul %7, %8, %cst_9 {dimension_numbers = #tpu.dot_dimension_numbers<[1], [0], [0], [1], [0, 0, 1, 1], [], []>} : vector<1x8xf32>, vector<8x32xf32>, vector<1x32xf32> -> vector<1x32xf32>
    %10 = arith.negf %9 : vector<1x32xf32>
    %11 = math.exp %10 : vector<1x32xf32>
    %cst_10 = arith.constant 1.000000e+00 : f32
    %12 = vector.broadcast %cst_10 : f32 to vector<1x32xf32>
    %13 = arith.addf %12, %11 : vector<1x32xf32>
    %14 = arith.divf %12, %13 : vector<1x32xf32>
    %15 = vector.shape_cast %14 : vector<1x32xf32> to vector<1x32x1xf32>
    %16 = vector.broadcast %15 : vector<1x32x1xf32> to vector<1x32x256xf32>
    %17 = arith.mulf %0, %16 : vector<1x32x256xf32>
    %18 = vector.shape_cast %17 : vector<1x32x256xf32> to vector<32x256xf32>
    %c0_11 = arith.constant 0 : index
    %c0_12 = arith.constant 0 : index
    %19 = vector.load %arg4[%c0_11, %c0_12] : memref<256x1024xf32, #tpu.memory_space<vmem>>, vector<256x1024xf32>
    %cst_13 = arith.constant dense<0.000000e+00> : vector<32x1024xf32>
    %20 = tpu.matmul %18, %19, %cst_13 {dimension_numbers = #tpu.dot_dimension_numbers<[1], [0], [0], [1], [0, 0, 1, 1], [], []>} : vector<32x256xf32>, vector<256x1024xf32>, vector<32x1024xf32> -> vector<32x1024xf32>
    %21 = vector.shape_cast %20 : vector<32x1024xf32> to vector<1x32x1024xf32>
    %c0_14 = arith.constant 0 : index
    %c0_15 = arith.constant 0 : index
    %c0_16 = arith.constant 0 : index
    %22 = vector.load %arg5[%c0_14, %c0_15, %c0_16] : memref<1x32x1024xf32, #tpu.memory_space<vmem>>, vector<1x32x1024xf32>
    tpu.vector_store %arg5[%c0_14, %c0_15, %c0_16], %21 {strides = array<i32>} : memref<1x32x1024xf32, #tpu.memory_space<vmem>>, vector<1x32x1024xf32>,
    return
  }
  func.func @transform_0(%arg0: i32) -> (i32, i32, i32) {
    %c0_i32 = arith.constant 0 : i32
    %c0_i32_0 = arith.constant 0 : i32
    %c0_i32_1 = arith.constant 0 : i32
    return %arg0, %c0_i32, %c0_i32_0 : i32, i32, i32
  }
  func.func @transform_1(%arg0: i32) -> (i32, i32) {
    %c0_i32 = arith.constant 0 : i32
    %c0_i32_0 = arith.constant 0 : i32
    %c0_i32_1 = arith.constant 0 : i32
    return %c0_i32, %c0_i32_0 : i32, i32
  }
  func.func @transform_2(%arg0: i32) -> (i32, i32) {
    %c0_i32 = arith.constant 0 : i32
    %c0_i32_0 = arith.constant 0 : i32
    %c0_i32_1 = arith.constant 0 : i32
    return %c0_i32, %c0_i32_0 : i32, i32
  }
  func.func @transform_3(%arg0: i32) -> (i32, i32) {
    %c0_i32 = arith.constant 0 : i32
    %c0_i32_0 = arith.constant 0 : i32
    %c0_i32_1 = arith.constant 0 : i32
    return %c0_i32, %c0_i32_0 : i32, i32
  }
  func.func @transform_4(%arg0: i32) -> (i32, i32, i32) {
    %c0_i32 = arith.constant 0 : i32
    %c0_i32_0 = arith.constant 0 : i32
    %c0_i32_1 = arith.constant 0 : i32
    return %arg0, %c0_i32, %c0_i32_0 : i32, i32, i32
  }
}

</mosaic_0001>

<bundles_post_ra>
// kernel: confident_block.1
= control target key start
LH: loop header
LB: loop body
LE: loop exit
PB: predicated region body
PF: predicated region fallthrough
CT: control target
= control target key end

     0   :  { %s1230_s15 = smov 0   ;;  %s2197_s0 = inlined_call_operand.vmem [shape: f32[2,32,256], index: 0, kind: input, shape index: {}]   ;;  %s2198_s1 = inlined_call_operand.vmem [shape: f32[32,8], index: 1, kind: input, shape index: {}]   ;;  %s2199_s2 = inlined_call_operand.vmem [shape: f32[8,32], index: 2, kind: input, shape index: {}]   ;;  %s2200_s3 = inlined_call_operand.vmem [shape: f32[256,1024], index: 3, kind: input, shape index: {}]   ;;  %s2201_s4 = inlined_call_operand.vmem [shape: f32[2,32,1024], index: 4, kind: output, shape index: {}]  }
   0x1 LB: > { %s1160_s16 = sadd.s32 4294967295, %s1202_s15   ;;  %p1164_p0 = scmp.ge.s32.totalorder %s1202_s15, 1  ;;  %s1202_s15 = sphi %s1230_s15, %s14_s15  }
   0x2   : > { %p162_p1 = scmp.lt.s32.totalorder %s1202_s15, 3 }
   0x4   : > { %p163_p2 = pnand %p1164_p0, %p162_p1 }
   0x5   : > { %p188_p3 = scmp.lt.s32.totalorder (!%p163_p2), %s1160_s16, 1 }
   0x6   : > { %166 = sbr.rel (%p163_p2) target bundleno = 789 (0x315), region = 36 }
   0xb   : > { %s2203_s16 = smov (!%p188_p3, %s1160_s16), 1  ;;  %v232_v12 = vld [vmem:[%s2198_s1 + $0x18] sm:$0xff]  ;;  %v231_v13 = vld [vmem:[%s2198_s1 + $0x10] sm:$0xff]  ;;  %v1204_v14 = vmov 256.0   ;;  %v230_v15 = vld [vmem:[%s2198_s1 + $0x8] sm:$0xff]  ;;  %v237_v22 = vlaneseq  ;;  %vm242_vm1 = vcmask 130112  }
   0xc   : > { %s1174_s17 = sshll.u32 %s2203_s16, 6  ;;  %267 = vmatpush.msra.mxu0 %v232_v12  ;;  %1190 = vrcp.f32 %v1204_v14  ;;  %v229_v16 = vld [vmem:[%s2198_s1] sm:$0xff]  ;;  %vm246_vm2 = vcmask 195712   ;;  %vm250_vm3 = vcmask 261312   ;;  %vm252_vm4 = vcmask 261120   ;;  %v474_v55 = vld [vmem:[%s2200_s3 + $0x3c8] sm:$0xff] }
   0xd   : > { %s192_s20 = scalar_lea.vmem %s2197_s0, %s1174_s17  ;;  %v238_v26 = vand.u32 127, %v237_v22  ;;  %v276_v43 = vld [vmem:[%s2199_s2] sm:$0xff]  ;;  %vm277_vm5 = vcmask 64512   ;;  %v1283_v46 = vshrl.u32 %v237_v22, 7  ;;  %v602_v56 = vld [vmem:[%s2200_s3 + $0x7c8] sm:$0xff]  ;;  %s1175_s13 = sshll.u32 %s2203_s16, 8 }
   0xe   : > { %v1244_v0 = vld [vmem:[%s192_s20] sm:$0xff]  ;;  %v1246_v1 = vld [vmem:[%s192_s20 + $0x8] sm:$0xff]  ;;  %v1256_v6 = vld [vmem:[%s192_s20 + $0x10] sm:$0xff]  ;;  %268 = vmatpush.msra.mxu0 %v231_v13  ;;  %296 = vmatpush.msra.mxu1 %v276_v43  ;;  %s2156_s18 = scalar_lea.vmem %s2201_s4, %s1175_s13 }
   0xf   : > { %v1248_v2 = vld [vmem:[%s192_s20 + $0x20] sm:$0xff]  ;;  %v206_v3 = vadd.f32 %v1246_v1, %v1244_v0  ;;  %v1252_v4 = vld [vmem:[%s192_s20 + $0x28] sm:$0xff]  ;;  %v1258_v7 = vld [vmem:[%s192_s20 + $0x18] sm:$0xff]  ;;  %v240_v28 = vadd.s32 4294967288, %v238_v26  ;;  %v244_v29 = vadd.s32 4294967280, %v238_v26  ;;  %v248_v32 = vadd.s32 4294967272, %v238_v26  ;;  %1185 = vset.pattern.permute.xlu2 %v1283_v46 }
  0x10   : > { %v212_v5 = vadd.f32 %v1252_v4, %v1248_v2  ;;  %v1260_v8 = vld [vmem:[%s192_s20 + $0x30] sm:$0xff]  ;;  %v1262_v9 = vld [vmem:[%s192_s20 + $0x38] sm:$0xff]  ;;  %v209_v10 = vadd.f32 %v1258_v7, %v1256_v6  ;;  %269 = vmatpush.msra.mxu0 %v230_v15  ;;  %v1287_v47 = vadd.s32 24, %v1283_v46  ;;  %v335_v48 = vadd.s32 16, %v1283_v46  ;;  %v473_v53 = vld [vmem:[%s2200_s3 + $0x3c0] sm:$0xff]  ;;  %667 = vmatpush.msrb.mxu1 %v474_v55 }
  0x11   : > { %207 = vadd.xlane.f32.xlu0 %v206_v3  ;;  %v215_v11 = vadd.f32 %v1262_v9, %v1260_v8  ;;  %v601_v54 = vld [vmem:[%s2200_s3 + $0x7c0] sm:$0xff]  ;;  %609 = vmatpush.msra.mxu2 %v473_v53  ;;  %v466_v60 = vld [vmem:[%s2200_s3 + $0x388] sm:$0xff] }
  0x12   : > { %213 = vadd.xlane.f32.xlu1 %v212_v5  ;;  %270 = vmatpush.msra.mxu0 %v229_v16  ;;  %v1191_v17 = vpop.eup %1190  ;;  %v465_v57 = vld [vmem:[%s2200_s3 + $0x380] sm:$0xff]  ;;  %v594_v61 = vld [vmem:[%s2200_s3 + $0x788] sm:$0xff] }
  0x13   : > { %v219_v18 = vmul.f32 256.0, %v1191_v17  ;;  %vm223_vm0 = vweird.f32 %v1191_v17  ;;  %1188 = vset.pattern.permute.xlu1 %v1287_v47  ;;  %1187 = vset.pattern.permute.xlu0 %v335_v48  ;;  %v593_v58 = vld [vmem:[%s2200_s3 + $0x780] sm:$0xff]  ;;  %v458_v5 = vld [vmem:[%s2200_s3 + $0x348] sm:$0xff] }
  0x14   : > { %638 = vmatpush.msra.mxu3 %v601_v54  ;;  %696 = vmatpush.msrb.mxu0 %v602_v56  ;;  %v457_v62 = vld [vmem:[%s2200_s3 + $0x340] sm:$0xff]  ;;  %v450_v14 = vld [vmem:[%s2200_s3 + $0x308] sm:$0xff] }
  0x15   : > { %v220_v19 = vsub.f32 1.0, %v219_v18  ;;  %610 = vmatpush.msra.mxu2 %v465_v57  ;;  %v585_v3 = vld [vmem:[%s2200_s3 + $0x740] sm:$0xff]  ;;  %668 = vmatpush.msrb.mxu1 %v466_v60  ;;  %v578_v15 = vld [vmem:[%s2200_s3 + $0x708] sm:$0xff] }
  0x16   : > { %639 = vmatpush.msra.mxu3 %v593_v58  ;;  %697 = vmatpush.msrb.mxu0 %v594_v61  ;;  %v577_v12 = vld [vmem:[%s2200_s3 + $0x700] sm:$0xff]  ;;  %v570_v22 = vld [vmem:[%s2200_s3 + $0x6c8] sm:$0xff] }
  0x17   : > { %v221_v20 = vmul.f32 %v1191_v17, %v220_v19  ;;  %611 = vmatpush.msra.mxu2 %v457_v62  ;;  %669 = vmatpush.msrb.mxu1 %v458_v5  ;;  %v569_v18 = vld [vmem:[%s2200_s3 + $0x6c0] sm:$0xff]  ;;  %v538_v43 = vld [vmem:[%s2200_s3 + $0x5c8] sm:$0xff] }
  0x18   : > { %640 = vmatpush.msra.mxu3 %v585_v3  ;;  %v402_v48 = vld [vmem:[%s2200_s3 + $0x188] sm:$0xff]  ;;  %v513_v55 = vld [vmem:[%s2200_s3 + $0x500] sm:$0xff] }
  0x19   : > { %210 = vadd.xlane.f32.xlu0 %v209_v10  ;;  %v222_v21 = vadd.f32 %v1191_v17, %v221_v20  ;;  %v586_v10 = vld [vmem:[%s2200_s3 + $0x748] sm:$0xff]  ;;  %670 = vmatpush.msrb.mxu1 %v450_v14  ;;  %v377_v58 = vld [vmem:[%s2200_s3 + $0xc0] sm:$0xff] }
  0x1a   : > { %216 = vadd.xlane.f32.xlu1 %v215_v11  ;;  %v449_v11 = vld [vmem:[%s2200_s3 + $0x300] sm:$0xff]  ;;  %698 = vmatpush.msrb.mxu0 %v586_v10  ;;  %v394_v53 = vld [vmem:[%s2200_s3 + $0x148] sm:$0xff] }
  0x1b   : > { %v224_v25 = vsel %vm223_vm0, %v1191_v17, %v222_v21  ;;  %v441_v17 = vld [vmem:[%s2200_s3 + $0x2c0] sm:$0xff]  ;;  %612 = vmatpush.msra.mxu2 %v449_v11  ;;  %641 = vmatpush.msra.mxu3 %v577_v12  ;;  %v442_v21 = vld [vmem:[%s2200_s3 + $0x2c8] sm:$0xff] }
  0x1c   : > { %699 = vmatpush.msrb.mxu0 %v578_v15  ;;  %671 = vmatpush.msrb.mxu1 %v442_v21  ;;  %v522_v54 = vld [vmem:[%s2200_s3 + $0x548] sm:$0xff]  ;;  %v369_v62 = vld [vmem:[%s2200_s3 + $0x80] sm:$0xff]  ;;  %v467_v21 = vld [vmem:[%s2200_s3 + $0x390] sm:$0xff] }
  0x1d   : > { %613 = vmatpush.msra.mxu2 %v441_v17  ;;  %642 = vmatpush.msra.mxu3 %v569_v18  ;;  %v386_v56 = vld [vmem:[%s2200_s3 + $0x108] sm:$0xff]  ;;  %v361_v10 = vld [vmem:[%s2200_s3 + $0x40] sm:$0xff]  ;;  %v603_v18 = vld [vmem:[%s2200_s3 + $0x7d0] sm:$0xff] }
  0x1e   : > { %700 = vmatpush.msrb.mxu0 %v570_v22  ;;  %v514_v57 = vld [vmem:[%s2200_s3 + $0x508] sm:$0xff]  ;;  %v489_v11 = vld [vmem:[%s2200_s3 + $0x440] sm:$0xff]  ;;  %v595_v22 = vld [vmem:[%s2200_s3 + $0x790] sm:$0xff] }
  0x1f   : > { %v378_v60 = vld [vmem:[%s2200_s3 + $0xc8] sm:$0xff]  ;;  %v353_v14 = vld [vmem:[%s2200_s3] sm:$0xff] }
  0x20   : > { %v506_v61 = vld [vmem:[%s2200_s3 + $0x4c8] sm:$0xff]  ;;  %v481_v15 = vld [vmem:[%s2200_s3 + $0x400] sm:$0xff] }
  0x21   : > { %v370_v3 = vld [vmem:[%s2200_s3 + $0x88] sm:$0xff] }
  0x22   : > { %v498_v5 = vld [vmem:[%s2200_s3 + $0x488] sm:$0xff] }
  0x23   : > { %v362_v12 = vld [vmem:[%s2200_s3 + $0x48] sm:$0xff] }
  0x24   : > { %v482_v17 = vld [vmem:[%s2200_s3 + $0x408] sm:$0xff] }
  0x84   : > { %v208_v23 = vpop.xlane.xlu0 %207 }
  0x85   : > { %v214_v24 = vpop.xlane.xlu1 %213  ;;  %v225_v27 = vmul.f32 %v224_v25, %v208_v23  ;;  %v433_v23 = vld [vmem:[%s2200_s3 + $0x280] sm:$0xff] }
  0x86   : > { %v227_v30 = vmul.f32 %v224_v25, %v214_v24  ;;  %v561_v24 = vld [vmem:[%s2200_s3 + $0x680] sm:$0xff]  ;;  %614 = vmatpush.msra.mxu2 %v433_v23  ;;  %v468_v23 = vld [vmem:[%s2200_s3 + $0x398] sm:$0xff] }
  0x87   : > { %v239_v36 = vperm.slane %v225_v27, %v238_v26  ;;  %v434_v26 = vld [vmem:[%s2200_s3 + $0x288] sm:$0xff]  ;;  %643 = vmatpush.msra.mxu3 %v561_v24  ;;  %v596_v24 = vld [vmem:[%s2200_s3 + $0x798] sm:$0xff] }
  0x88   : > { %v245_v38 = vperm.slane %v227_v30, %v244_v29  ;;  %v562_v27 = vld [vmem:[%s2200_s3 + $0x688] sm:$0xff]  ;;  %v425_v29 = vld [vmem:[%s2200_s3 + $0x240] sm:$0xff]  ;;  %672 = vmatpush.msrb.mxu1 %v434_v26  ;;  %v587_v26 = vld [vmem:[%s2200_s3 + $0x750] sm:$0xff] }
  0x89   : > { %v553_v30 = vld [vmem:[%s2200_s3 + $0x640] sm:$0xff]  ;;  %701 = vmatpush.msrb.mxu0 %v562_v27  ;;  %615 = vmatpush.msra.mxu2 %v425_v29  ;;  %v460_v27 = vld [vmem:[%s2200_s3 + $0x358] sm:$0xff]  ;;  %v451_v29 = vld [vmem:[%s2200_s3 + $0x310] sm:$0xff] }
  0x8a   : > { %644 = vmatpush.msra.mxu3 %v553_v30  ;;  %v579_v30 = vld [vmem:[%s2200_s3 + $0x710] sm:$0xff] }
  0x8c   : > { %v211_v31 = vpop.xlane.xlu0 %210 }
  0x8d   : > { %v226_v33 = vmul.f32 %v224_v25, %v211_v31  ;;  %v217_v34 = vpop.xlane.xlu1 %216 }
  0x8e   : > { %v228_v35 = vmul.f32 %v224_v25, %v217_v34 }
  0x8f   : > { %v241_v37 = vperm.slane %v226_v33, %v240_v28  ;;  %v554_v33 = vld [vmem:[%s2200_s3 + $0x648] sm:$0xff] }
  0x90   : > { %v249_v39 = vperm.slane %v228_v35, %v248_v32  ;;  %v426_v32 = vld [vmem:[%s2200_s3 + $0x248] sm:$0xff]  ;;  %702 = vmatpush.msrb.mxu0 %v554_v33  ;;  %v443_v33 = vld [vmem:[%s2200_s3 + $0x2d0] sm:$0xff] }
  0x91   : > { %v243_v40 = vsel %vm242_vm1, %v241_v37, %v239_v36  ;;  %v417_v36 = vld [vmem:[%s2200_s3 + $0x200] sm:$0xff]  ;;  %673 = vmatpush.msrb.mxu1 %v426_v32  ;;  %v580_v32 = vld [vmem:[%s2200_s3 + $0x718] sm:$0xff] }
  0x92   : > { %v247_v41 = vsel %vm246_vm2, %v245_v38, %v243_v40  ;;  %v545_v37 = vld [vmem:[%s2200_s3 + $0x600] sm:$0xff]  ;;  %v418_v38 = vld [vmem:[%s2200_s3 + $0x208] sm:$0xff]  ;;  %616 = vmatpush.msra.mxu2 %v417_v36  ;;  %v572_v36 = vld [vmem:[%s2200_s3 + $0x6d8] sm:$0xff] }
  0x93   : > { %v251_v42 = vsel %vm250_vm3, %v249_v39, %v247_v41  ;;  %v546_v39 = vld [vmem:[%s2200_s3 + $0x608] sm:$0xff]  ;;  %v409_v40 = vld [vmem:[%s2200_s3 + $0x1c0] sm:$0xff]  ;;  %645 = vmatpush.msra.mxu3 %v545_v37  ;;  %674 = vmatpush.msrb.mxu1 %v418_v38  ;;  %v435_v37 = vld [vmem:[%s2200_s3 + $0x290] sm:$0xff] }
  0x94   : > { %1169 = vmatmul.msk.f32.vlgmr.msra.gmra.mxu0 %vm252_vm4, %v251_v42  ;;  %v537_v41 = vld [vmem:[%s2200_s3 + $0x5c0] sm:$0xff]  ;;  %v410_v42 = vld [vmem:[%s2200_s3 + $0x1c8] sm:$0xff]  ;;  %617 = vmatpush.msra.mxu2 %v409_v40  ;;  %v563_v38 = vld [vmem:[%s2200_s3 + $0x690] sm:$0xff] }
  0x95   : > { %703 = vmatpush.msrb.mxu0 %v546_v39  ;;  %646 = vmatpush.msra.mxu3 %v537_v41  ;;  %v436_v39 = vld [vmem:[%s2200_s3 + $0x298] sm:$0xff]  ;;  %v427_v41 = vld [vmem:[%s2200_s3 + $0x250] sm:$0xff] }
  0x96   : > { %675 = vmatpush.msrb.mxu1 %v410_v42  ;;  %v564_v40 = vld [vmem:[%s2200_s3 + $0x698] sm:$0xff]  ;;  %v555_v42 = vld [vmem:[%s2200_s3 + $0x650] sm:$0xff] }
  0x97   : > { %704 = vmatpush.msrb.mxu0 %v538_v43  ;;  %v428_v43 = vld [vmem:[%s2200_s3 + $0x258] sm:$0xff] }
  0x98   : > { %676 = vmatpush.msrb.mxu1 %v402_v48  ;;  %v547_v48 = vld [vmem:[%s2200_s3 + $0x610] sm:$0xff] }
  0x9a   : > { %677 = vmatpush.msrb.mxu1 %v394_v53  ;;  %v412_v53 = vld [vmem:[%s2200_s3 + $0x1d8] sm:$0xff] }
  0x9c   : > { %678 = vmatpush.msrb.mxu1 %v386_v56  ;;  %v404_v56 = vld [vmem:[%s2200_s3 + $0x198] sm:$0xff] }
  0x9e   : > { %679 = vmatpush.msrb.mxu1 %v378_v60  ;;  %v396_v60 = vld [vmem:[%s2200_s3 + $0x158] sm:$0xff] }
  0xa0   : > { %680 = vmatpush.msrb.mxu1 %v370_v3 }
  0xa2   : > { %681 = vmatpush.msrb.mxu1 %v362_v12  ;;  %v507_v12 = vld [vmem:[%s2200_s3 + $0x4d0] sm:$0xff] }
 0x111   : > { %v272_v44 = vpop.f32.mrf.mxu0 }
 0x112   : > { %v275_v45 = vmax.f32 %v272_v44, 0.0  ;;  %v401_v44 = vld [vmem:[%s2200_s3 + $0x180] sm:$0xff] }
 0x113   : > { %618 = vmatpush.msra.mxu2 %v401_v44  ;;  %v556_v44 = vld [vmem:[%s2200_s3 + $0x658] sm:$0xff] }
 0x114   : > { %1170 = vmatmul.msk.f32.vlgmr.msra.gmra.mxu1 %vm277_vm5, %v275_v45  ;;  %v529_v45 = vld [vmem:[%s2200_s3 + $0x580] sm:$0xff] }
 0x115   : > { %647 = vmatpush.msra.mxu3 %v529_v45  ;;  %v419_v45 = vld [vmem:[%s2200_s3 + $0x210] sm:$0xff] }
 0x191   : > { %v298_v49 = vpop.f32.mrf.mxu1 }
 0x192   : > { %v1171_v50 = vmul.f32 -1.442695, %v298_v49  ;;  %v530_v49 = vld [vmem:[%s2200_s3 + $0x588] sm:$0xff] }
 0x193   : > { %705 = vmatpush.msrb.mxu0 %v530_v49  ;;  %v420_v49 = vld [vmem:[%s2200_s3 + $0x218] sm:$0xff] }
 0x194   : > { %1192 = vpow2.f32 %v1171_v50  ;;  %v393_v50 = vld [vmem:[%s2200_s3 + $0x140] sm:$0xff] }
 0x195   : > { %619 = vmatpush.msra.mxu2 %v393_v50  ;;  %706 = vmatpush.msrb.mxu0 %v522_v54  ;;  %v548_v50 = vld [vmem:[%s2200_s3 + $0x618] sm:$0xff] }
 0x196   : > { %v540_v54 = vld [vmem:[%s2200_s3 + $0x5d8] sm:$0xff] }
 0x197   : > { %707 = vmatpush.msrb.mxu0 %v514_v57  ;;  %v532_v57 = vld [vmem:[%s2200_s3 + $0x598] sm:$0xff] }
 0x199   : > { %708 = vmatpush.msrb.mxu0 %v506_v61  ;;  %v524_v61 = vld [vmem:[%s2200_s3 + $0x558] sm:$0xff] }
 0x19a   : > { %v1193_v51 = vpop.eup %1192 }
 0x19b   : > { %v304_v52 = vadd.f32 1.0, %v1193_v51  ;;  %v329_v51 = vadd.s32 8, %v1283_v46  ;;  %v385_v46 = vld [vmem:[%s2200_s3 + $0x100] sm:$0xff]  ;;  %709 = vmatpush.msrb.mxu0 %v498_v5  ;;  %v387_v5 = vld [vmem:[%s2200_s3 + $0x110] sm:$0xff] }
 0x19c   : > { %620 = vmatpush.msra.mxu2 %v385_v46  ;;  %v403_v46 = vld [vmem:[%s2200_s3 + $0x190] sm:$0xff] }
 0x19d   : > { %1194 = vrcp.f32 %v304_v52  ;;  %v316_v16 = vand.u32 2147483648, %v304_v52  ;;  %v314_v20 = vand.u32 2147483647, %v304_v52  ;;  %vm310_vm7 = vweird.f32 %v304_v52 }
 0x19e   : > { %621 = vmatpush.msra.mxu2 %v377_v58  ;;  %v395_v58 = vld [vmem:[%s2200_s3 + $0x150] sm:$0xff] }
 0x19f   : > { %v317_v28 = vor.u32 1.1754944e-38, %v316_v16  ;;  %vm315_vm9 = vcmp.eq.f32.partialorder %v314_v20, 8.507059e+37  ;;  %v354_v16 = vld [vmem:[%s2200_s3 + $0x8] sm:$0xff]  ;;  %v604_v20 = vld [vmem:[%s2200_s3 + $0x7d8] sm:$0xff] }
 0x1a0   : > { %622 = vmatpush.msra.mxu2 %v369_v62  ;;  %682 = vmatpush.msrb.mxu1 %v354_v16  ;;  %v499_v16 = vld [vmem:[%s2200_s3 + $0x490] sm:$0xff] }
 0x1a2   : > { %623 = vmatpush.msra.mxu2 %v361_v10  ;;  %v515_v10 = vld [vmem:[%s2200_s3 + $0x510] sm:$0xff] }
 0x1a3   : > { %v1195_v59 = vpop.eup %1194 }
 0x1a4   : > { %v306_v63 = vmul.f32 %v1195_v59, %v304_v52  ;;  %vm311_vm6 = vweird.f32 %v1195_v59  ;;  %v521_v52 = vld [vmem:[%s2200_s3 + $0x540] sm:$0xff]  ;;  %624 = vmatpush.msra.mxu2 %v353_v14  ;;  %v508_v14 = vld [vmem:[%s2200_s3 + $0x4d8] sm:$0xff] }
 0x1a5   : > { %vm312_vm8 = vmor %vm310_vm7, %vm311_vm6  ;;  %648 = vmatpush.msra.mxu3 %v521_v52  ;;  %v539_v52 = vld [vmem:[%s2200_s3 + $0x5d0] sm:$0xff] }
 0x1a6   : > { %v307_v13 = vsub.f32 1.0, %v306_v63  ;;  %v497_v63 = vld [vmem:[%s2200_s3 + $0x480] sm:$0xff] }
 0x1a7   : > { %649 = vmatpush.msra.mxu3 %v513_v55  ;;  %v531_v55 = vld [vmem:[%s2200_s3 + $0x590] sm:$0xff] }
 0x1a8   : > { %v308_v19 = vmul.f32 %v1195_v59, %v307_v13  ;;  %v490_v13 = vld [vmem:[%s2200_s3 + $0x448] sm:$0xff] }
 0x1a9   : > { %710 = vmatpush.msrb.mxu0 %v490_v13  ;;  %v380_v13 = vld [vmem:[%s2200_s3 + $0xd8] sm:$0xff] }
 0x1aa   : > { %v309_v25 = vadd.f32 %v1195_v59, %v308_v19  ;;  %v476_v19 = vld [vmem:[%s2200_s3 + $0x3d8] sm:$0xff] }
 0x1ab   : > { %711 = vmatpush.msrb.mxu0 %v482_v17  ;;  %783 = vmatpush.msra.mxu1 %v476_v19  ;;  %v372_v17 = vld [vmem:[%s2200_s3 + $0x98] sm:$0xff]  ;;  %v491_v19 = vld [vmem:[%s2200_s3 + $0x450] sm:$0xff] }
 0x1ac   : > { %v313_v31 = vsel %vm312_vm8, %v1195_v59, %v309_v25  ;;  %v505_v59 = vld [vmem:[%s2200_s3 + $0x4c0] sm:$0xff]  ;;  %v459_v25 = vld [vmem:[%s2200_s3 + $0x350] sm:$0xff] }
 0x1ad   : > { %v318_v34 = vsel %vm315_vm9, %v317_v28, %v313_v31  ;;  %650 = vmatpush.msra.mxu3 %v505_v59  ;;  %812 = vmatpush.msra.mxu0 %v604_v20  ;;  %v588_v28 = vld [vmem:[%s2200_s3 + $0x758] sm:$0xff]  ;;  %v523_v59 = vld [vmem:[%s2200_s3 + $0x550] sm:$0xff] }
 0x1ae   : > { %v1376_v35 = vperm.slane %v318_v34, 0  ;;  %784 = vmatpush.msra.mxu1 %v468_v23  ;;  %v452_v31 = vld [vmem:[%s2200_s3 + $0x318] sm:$0xff]  ;;  %v571_v34 = vld [vmem:[%s2200_s3 + $0x6d0] sm:$0xff] }
 0x1af   : > { %651 = vmatpush.msra.mxu3 %v497_v63  ;;  %813 = vmatpush.msra.mxu0 %v596_v24  ;;  %v364_v20 = vld [vmem:[%s2200_s3 + $0x58] sm:$0xff]  ;;  %v483_v23 = vld [vmem:[%s2200_s3 + $0x410] sm:$0xff] }
 0x1b0   : > { %343 = vperm.xlu1 %1188, %v1376_v35   ;;  %337 = vperm.xlu0 %1187, %v1376_v35   ;;  %v356_v24 = vld [vmem:[%s2200_s3 + $0x18] sm:$0xff] }
 0x1b1   : > { %325 = vperm.xlu2 %1185, %v1376_v35   ;;  %652 = vmatpush.msra.mxu3 %v489_v11  ;;  %v379_v11 = vld [vmem:[%s2200_s3 + $0xd0] sm:$0xff] }
 0x1b2   : > { %785 = vmatpush.msra.mxu1 %v460_v27  ;;  %814 = vmatpush.msra.mxu0 %v588_v28  ;;  %v605_v27 = vld [vmem:[%s2200_s3 + $0x7e0] sm:$0xff]  ;;  %v478_v28 = vld [vmem:[%s2200_s3 + $0x3e8] sm:$0xff] }
 0x1b3   : > { %653 = vmatpush.msra.mxu3 %v481_v15  ;;  %v371_v15 = vld [vmem:[%s2200_s3 + $0x90] sm:$0xff] }
 0x1b4   : > { %786 = vmatpush.msra.mxu1 %v452_v31  ;;  %815 = vmatpush.msra.mxu0 %v580_v32  ;;  %v597_v31 = vld [vmem:[%s2200_s3 + $0x7a0] sm:$0xff]  ;;  %v470_v32 = vld [vmem:[%s2200_s3 + $0x3a8] sm:$0xff] }
 0x1b5   : > { %754 = vmatpush.msrb.mxu3 %v603_v18  ;;  %v363_v18 = vld [vmem:[%s2200_s3 + $0x50] sm:$0xff] }
 0x1b6   : > { %816 = vmatpush.msra.mxu0 %v572_v36 }
 0x1b7   : > { %755 = vmatpush.msrb.mxu3 %v595_v22  ;;  %v355_v22 = vld [vmem:[%s2200_s3 + $0x10] sm:$0xff] }
 0x1b8   : > { %1189 = vset.pattern.permute.xlu0 %v1287_v47  ;;  %v475_v47 = vld [vmem:[%s2200_s3 + $0x3d0] sm:$0xff]  ;;  %817 = vmatpush.msra.mxu0 %v564_v40  ;;  %v581_v40 = vld [vmem:[%s2200_s3 + $0x720] sm:$0xff] }
 0x1b9   : > { %1186 = vset.pattern.permute.xlu2 %v329_v51  ;;  %725 = vmatpush.msrb.mxu2 %v475_v47  ;;  %v411_v51 = vld [vmem:[%s2200_s3 + $0x1d0] sm:$0xff]  ;;  %v500_v47 = vld [vmem:[%s2200_s3 + $0x498] sm:$0xff] }
 0x1ba   : > { %756 = vmatpush.msrb.mxu3 %v587_v26  ;;  %818 = vmatpush.msra.mxu0 %v556_v44  ;;  %v477_v26 = vld [vmem:[%s2200_s3 + $0x3e0] sm:$0xff] }
 0x1bb   : > { %726 = vmatpush.msrb.mxu2 %v467_v21  ;;  %v492_v21 = vld [vmem:[%s2200_s3 + $0x458] sm:$0xff] }
 0x1bc   : > { %757 = vmatpush.msrb.mxu3 %v579_v30  ;;  %819 = vmatpush.msra.mxu0 %v548_v50  ;;  %v469_v30 = vld [vmem:[%s2200_s3 + $0x3a0] sm:$0xff] }
 0x1bd   : > { %727 = vmatpush.msrb.mxu2 %v459_v25  ;;  %v484_v25 = vld [vmem:[%s2200_s3 + $0x418] sm:$0xff] }
 0x1be   : > { %758 = vmatpush.msrb.mxu3 %v571_v34  ;;  %820 = vmatpush.msra.mxu0 %v540_v54  ;;  %v429_v54 = vld [vmem:[%s2200_s3 + $0x260] sm:$0xff] }
 0x1bf   : > { %728 = vmatpush.msrb.mxu2 %v451_v29  ;;  %v606_v29 = vld [vmem:[%s2200_s3 + $0x7e8] sm:$0xff] }
 0x1c0   : > { %759 = vmatpush.msrb.mxu3 %v563_v38  ;;  %821 = vmatpush.msra.mxu0 %v532_v57  ;;  %v589_v38 = vld [vmem:[%s2200_s3 + $0x760] sm:$0xff]  ;;  %v558_v57 = vld [vmem:[%s2200_s3 + $0x668] sm:$0xff] }
 0x1c1   : > { %331 = vperm.xlu2 %1186, %v1376_v35   ;;  %v444_v35 = vld [vmem:[%s2200_s3 + $0x2d8] sm:$0xff]  ;;  %729 = vmatpush.msrb.mxu2 %v443_v33  ;;  %v598_v33 = vld [vmem:[%s2200_s3 + $0x7a8] sm:$0xff] }
 0x1c2   : > { %787 = vmatpush.msra.mxu1 %v444_v35  ;;  %760 = vmatpush.msrb.mxu3 %v555_v42  ;;  %v582_v42 = vld [vmem:[%s2200_s3 + $0x728] sm:$0xff] }
 0x1c3   : > { %730 = vmatpush.msrb.mxu2 %v435_v37  ;;  %822 = vmatpush.msra.mxu0 %v524_v61  ;;  %v461_v37 = vld [vmem:[%s2200_s3 + $0x360] sm:$0xff] }
 0x1c4   : > { %788 = vmatpush.msra.mxu1 %v436_v39  ;;  %761 = vmatpush.msrb.mxu3 %v547_v48  ;;  %v453_v39 = vld [vmem:[%s2200_s3 + $0x320] sm:$0xff]  ;;  %v446_v48 = vld [vmem:[%s2200_s3 + $0x2e8] sm:$0xff] }
 0x1c5   : > { %731 = vmatpush.msrb.mxu2 %v427_v41  ;;  %v454_v41 = vld [vmem:[%s2200_s3 + $0x328] sm:$0xff] }
 0x1c6   : > { %789 = vmatpush.msra.mxu1 %v428_v43  ;;  %762 = vmatpush.msrb.mxu3 %v539_v52  ;;  %v445_v43 = vld [vmem:[%s2200_s3 + $0x2e0] sm:$0xff] }
 0x1c7   : > { %732 = vmatpush.msrb.mxu2 %v419_v45  ;;  %v573_v45 = vld [vmem:[%s2200_s3 + $0x6e0] sm:$0xff] }
 0x1c8   : > { %790 = vmatpush.msra.mxu1 %v420_v49  ;;  %763 = vmatpush.msrb.mxu3 %v531_v55  ;;  %v437_v52 = vld [vmem:[%s2200_s3 + $0x2a0] sm:$0xff]  ;;  %v430_v55 = vld [vmem:[%s2200_s3 + $0x268] sm:$0xff] }
 0x1c9   : > { %733 = vmatpush.msrb.mxu2 %v411_v51  ;;  %v574_v51 = vld [vmem:[%s2200_s3 + $0x6e8] sm:$0xff] }
 0x1ca   : > { %791 = vmatpush.msra.mxu1 %v412_v53  ;;  %764 = vmatpush.msrb.mxu3 %v523_v59  ;;  %v566_v53 = vld [vmem:[%s2200_s3 + $0x6a8] sm:$0xff]  ;;  %v549_v59 = vld [vmem:[%s2200_s3 + $0x620] sm:$0xff] }
 0x1cb   : > { %734 = vmatpush.msrb.mxu2 %v403_v46  ;;  %v557_v46 = vld [vmem:[%s2200_s3 + $0x660] sm:$0xff] }
 0x1cc   : > { %792 = vmatpush.msra.mxu1 %v404_v56  ;;  %765 = vmatpush.msrb.mxu3 %v515_v10  ;;  %v413_v10 = vld [vmem:[%s2200_s3 + $0x1e0] sm:$0xff] }
 0x1cd   : > { %735 = vmatpush.msrb.mxu2 %v395_v58  ;;  %v421_v58 = vld [vmem:[%s2200_s3 + $0x220] sm:$0xff] }
 0x1ce   : > { %793 = vmatpush.msra.mxu1 %v396_v60  ;;  %766 = vmatpush.msrb.mxu3 %v507_v12  ;;  %v422_v60 = vld [vmem:[%s2200_s3 + $0x228] sm:$0xff] }
 0x1cf   : > { %736 = vmatpush.msrb.mxu2 %v387_v5  ;;  %v550_v5 = vld [vmem:[%s2200_s3 + $0x628] sm:$0xff] }
 0x1d0   : > { %767 = vmatpush.msrb.mxu3 %v499_v16  ;;  %v406_v12 = vld [vmem:[%s2200_s3 + $0x1a8] sm:$0xff] }
 0x1d1   : > { %737 = vmatpush.msrb.mxu2 %v379_v11  ;;  %v533_v11 = vld [vmem:[%s2200_s3 + $0x5a0] sm:$0xff]  ;;  %v398_v16 = vld [vmem:[%s2200_s3 + $0x168] sm:$0xff] }
 0x1d2   : > { %768 = vmatpush.msrb.mxu3 %v491_v19  ;;  %v390_v19 = vld [vmem:[%s2200_s3 + $0x128] sm:$0xff] }
 0x1d3   : > { %738 = vmatpush.msrb.mxu2 %v371_v15  ;;  %v525_v15 = vld [vmem:[%s2200_s3 + $0x560] sm:$0xff] }
 0x1d4   : > { %769 = vmatpush.msrb.mxu3 %v483_v23  ;;  %v382_v23 = vld [vmem:[%s2200_s3 + $0xe8] sm:$0xff] }
 0x1d5   : > { %739 = vmatpush.msrb.mxu2 %v363_v18  ;;  %v517_v18 = vld [vmem:[%s2200_s3 + $0x520] sm:$0xff] }
 0x1d7   : > { %740 = vmatpush.msrb.mxu2 %v355_v22  ;;  %v509_v22 = vld [vmem:[%s2200_s3 + $0x4e0] sm:$0xff] }
 0x20b   : > { %v326_v62 = vpop.permute.xlu2 %325 }
 0x20c   : > { %v1625_v63 = vmul.f32 %v326_v62, %v1244_v0  ;;  %v1628_v3 = vmul.f32 %v326_v62, %v1246_v1  ;;  %v388_v0 = vld [vmem:[%s2200_s3 + $0x118] sm:$0xff] }
 0x20d   : > { %v516_v1 = vld [vmem:[%s2200_s3 + $0x518] sm:$0xff]  ;;  %794 = vmatpush.msra.mxu1 %v388_v0  ;;  %v542_v0 = vld [vmem:[%s2200_s3 + $0x5e8] sm:$0xff] }
 0x20e   : > { %625 = vmatmul.f32.vlgmr.msra.gmra.mxu2 %v1625_v63  ;;  %654 = vmatmul.f32.vlgmr.msra.gmra.mxu3 %v1628_v3 }
 0x20f   : > { %683 = vmatmul.f32.vlgmr.msrb.gmra.mxu1 %v1625_v63  ;;  %712 = vmatmul.f32.vlgmr.msrb.gmra.mxu0 %v1628_v3 }
 0x210   : > { %823 = vmatpush.msra.mxu0 %v516_v1  ;;  %795 = vmatpush.msra.mxu1 %v380_v13  ;;  %v405_v1 = vld [vmem:[%s2200_s3 + $0x1a0] sm:$0xff]  ;;  %v534_v13 = vld [vmem:[%s2200_s3 + $0x5a8] sm:$0xff] }
 0x211   : > { %841 = vmatpush.msra.mxu2 %v477_v26  ;;  %870 = vmatpush.msra.mxu3 %v605_v27  ;;  %v501_v26 = vld [vmem:[%s2200_s3 + $0x4a0] sm:$0xff]  ;;  %v374_v27 = vld [vmem:[%s2200_s3 + $0xa8] sm:$0xff] }
 0x212   : > { %824 = vmatpush.msra.mxu0 %v508_v14  ;;  %796 = vmatpush.msra.mxu1 %v372_v17  ;;  %v397_v14 = vld [vmem:[%s2200_s3 + $0x160] sm:$0xff]  ;;  %v526_v17 = vld [vmem:[%s2200_s3 + $0x568] sm:$0xff] }
 0x213   : > { %842 = vmatpush.msra.mxu2 %v469_v30  ;;  %871 = vmatpush.msra.mxu3 %v597_v31  ;;  %v493_v30 = vld [vmem:[%s2200_s3 + $0x460] sm:$0xff]  ;;  %v366_v31 = vld [vmem:[%s2200_s3 + $0x68] sm:$0xff] }
 0x214   : > { %825 = vmatpush.msra.mxu0 %v500_v47  ;;  %797 = vmatpush.msra.mxu1 %v364_v20  ;;  %v389_v47 = vld [vmem:[%s2200_s3 + $0x120] sm:$0xff]  ;;  %v518_v20 = vld [vmem:[%s2200_s3 + $0x528] sm:$0xff] }
 0x215   : > { %843 = vmatpush.msra.mxu2 %v461_v37  ;;  %872 = vmatpush.msra.mxu3 %v589_v38  ;;  %v358_v37 = vld [vmem:[%s2200_s3 + $0x28] sm:$0xff] }
 0x216   : > { %826 = vmatpush.msra.mxu0 %v492_v21  ;;  %798 = vmatpush.msra.mxu1 %v356_v24  ;;  %v381_v21 = vld [vmem:[%s2200_s3 + $0xe0] sm:$0xff]  ;;  %v510_v24 = vld [vmem:[%s2200_s3 + $0x4e8] sm:$0xff] }
 0x217   : > { %844 = vmatpush.msra.mxu2 %v453_v39  ;;  %873 = vmatpush.msra.mxu3 %v581_v40  ;;  %v486_v38 = vld [vmem:[%s2200_s3 + $0x428] sm:$0xff]  ;;  %v480_v39 = vld [vmem:[%s2200_s3 + $0x3f8] sm:$0xff] }
 0x218   : > { %827 = vmatpush.msra.mxu0 %v484_v25  ;;  %899 = vmatpush.msrb.mxu1 %v478_v28  ;;  %v373_v25 = vld [vmem:[%s2200_s3 + $0xa0] sm:$0xff]  ;;  %v502_v28 = vld [vmem:[%s2200_s3 + $0x4a8] sm:$0xff]  ;;  %v608_v40 = vld [vmem:[%s2200_s3 + $0x7f8] sm:$0xff] }
 0x219   : > { %845 = vmatpush.msra.mxu2 %v445_v43  ;;  %874 = vmatpush.msra.mxu3 %v573_v45  ;;  %v472_v43 = vld [vmem:[%s2200_s3 + $0x3b8] sm:$0xff]  ;;  %v463_v45 = vld [vmem:[%s2200_s3 + $0x370] sm:$0xff] }
 0x21a   : > { %928 = vmatpush.msrb.mxu0 %v606_v29  ;;  %900 = vmatpush.msrb.mxu1 %v470_v32  ;;  %v365_v29 = vld [vmem:[%s2200_s3 + $0x60] sm:$0xff]  ;;  %v494_v32 = vld [vmem:[%s2200_s3 + $0x468] sm:$0xff] }
 0x21b   : > { %v332_v34 = vpop.permute.xlu2 %331  ;;  %846 = vmatpush.msra.mxu2 %v437_v52  ;;  %v592_v52 = vld [vmem:[%s2200_s3 + $0x778] sm:$0xff] }
 0x21c   : > { %v1719_v35 = vmul.f32 %v332_v34, %v1256_v6  ;;  %v1722_v36 = vmul.f32 %v332_v34, %v1258_v7  ;;  %929 = vmatpush.msrb.mxu0 %v598_v33  ;;  %v462_v6 = vld [vmem:[%s2200_s3 + $0x368] sm:$0xff]  ;;  %v357_v33 = vld [vmem:[%s2200_s3 + $0x20] sm:$0xff] }
 0x21d   : > { %v590_v7 = vld [vmem:[%s2200_s3 + $0x768] sm:$0xff]  ;;  %901 = vmatpush.msrb.mxu1 %v462_v6  ;;  %847 = vmatpush.msra.mxu2 %v429_v54  ;;  %v485_v34 = vld [vmem:[%s2200_s3 + $0x420] sm:$0xff]  ;;  %v479_v6 = vld [vmem:[%s2200_s3 + $0x3f0] sm:$0xff] }
 0x21e   : > { %628 = vmatmul.f32.gmra.mxu2 %v1719_v35  ;;  %657 = vmatmul.f32.gmra.mxu3 %v1722_v36  ;;  %v584_v54 = vld [vmem:[%s2200_s3 + $0x738] sm:$0xff] }
 0x21f   : > { %686 = vmatmul.f32.gmra.mxu1 %v1719_v35  ;;  %715 = vmatmul.f32.gmra.mxu0 %v1722_v36 }
 0x220   : > { %930 = vmatpush.msrb.mxu0 %v590_v7  ;;  %902 = vmatpush.msrb.mxu1 %v454_v41  ;;  %v607_v7 = vld [vmem:[%s2200_s3 + $0x7f0] sm:$0xff] }
 0x221   : > { %848 = vmatpush.msra.mxu2 %v421_v58  ;;  %v471_v41 = vld [vmem:[%s2200_s3 + $0x3b0] sm:$0xff] }
 0x222   : > { %v338_v44 = vpop.permute.xlu0 %337  ;;  %931 = vmatpush.msrb.mxu0 %v582_v42  ;;  %903 = vmatpush.msrb.mxu1 %v446_v48  ;;  %v344_v56 = vpop.permute.xlu1 %343  ;;  %v599_v42 = vld [vmem:[%s2200_s3 + $0x7b0] sm:$0xff] }
 0x223   : > { %v1762_v49 = vmul.f32 %v338_v44, %v1248_v2  ;;  %v1765_v50 = vmul.f32 %v338_v44, %v1252_v4  ;;  %v565_v2 = vld [vmem:[%s2200_s3 + $0x6a0] sm:$0xff]  ;;  %v438_v4 = vld [vmem:[%s2200_s3 + $0x2a8] sm:$0xff]  ;;  %v1808_v61 = vmul.f32 %v344_v56, %v1260_v8  ;;  %v1811_v62 = vmul.f32 %v344_v56, %v1262_v9  ;;  %849 = vmatpush.msra.mxu2 %v413_v10  ;;  %v600_v44 = vld [vmem:[%s2200_s3 + $0x7b8] sm:$0xff] }
 0x224   : > { %932 = vmatpush.msrb.mxu0 %v574_v51  ;;  %875 = vmatpush.msra.mxu3 %v565_v2  ;;  %v541_v8 = vld [vmem:[%s2200_s3 + $0x5e0] sm:$0xff]  ;;  %v414_v9 = vld [vmem:[%s2200_s3 + $0x1e8] sm:$0xff]  ;;  %v591_v48 = vld [vmem:[%s2200_s3 + $0x770] sm:$0xff] }
 0x225   : > { %904 = vmatpush.msrb.mxu1 %v438_v4  ;;  %850 = vmatpush.msra.mxu2 %v405_v1  ;;  %v464_v51 = vld [vmem:[%s2200_s3 + $0x378] sm:$0xff]  ;;  %v455_v2 = vld [vmem:[%s2200_s3 + $0x330] sm:$0xff] }
 0x226   : > { %631 = vmatmul.f32.gmra.mxu2 %v1762_v49  ;;  %660 = vmatmul.f32.gmra.mxu3 %v1765_v50  ;;  %v583_v4 = vld [vmem:[%s2200_s3 + $0x730] sm:$0xff]  ;;  %v448_v56 = vld [vmem:[%s2200_s3 + $0x2f8] sm:$0xff] }
 0x227   : > { %689 = vmatmul.f32.gmra.mxu1 %v1762_v49  ;;  %718 = vmatmul.f32.gmra.mxu0 %v1765_v50  ;;  %v439_v58 = vld [vmem:[%s2200_s3 + $0x2b0] sm:$0xff] }
 0x228   : > { %933 = vmatpush.msrb.mxu0 %v566_v53  ;;  %876 = vmatpush.msra.mxu3 %v557_v46  ;;  %v456_v53 = vld [vmem:[%s2200_s3 + $0x338] sm:$0xff]  ;;  %v447_v46 = vld [vmem:[%s2200_s3 + $0x2f0] sm:$0xff] }
 0x229   : > { %905 = vmatpush.msrb.mxu1 %v430_v55  ;;  %851 = vmatpush.msra.mxu2 %v397_v14  ;;  %v575_v55 = vld [vmem:[%s2200_s3 + $0x6f0] sm:$0xff] }
 0x22a   : > { %934 = vmatpush.msrb.mxu0 %v558_v57  ;;  %877 = vmatpush.msra.mxu3 %v549_v59  ;;  %v576_v57 = vld [vmem:[%s2200_s3 + $0x6f8] sm:$0xff]  ;;  %v567_v59 = vld [vmem:[%s2200_s3 + $0x6b0] sm:$0xff] }
 0x22b   : > { %906 = vmatpush.msrb.mxu1 %v422_v60  ;;  %852 = vmatpush.msra.mxu2 %v389_v47  ;;  %v440_v60 = vld [vmem:[%s2200_s3 + $0x2b8] sm:$0xff]  ;;  %v431_v10 = vld [vmem:[%s2200_s3 + $0x270] sm:$0xff] }
 0x22c   : > { %935 = vmatpush.msrb.mxu0 %v550_v5  ;;  %878 = vmatpush.msra.mxu3 %v541_v8  ;;  %v568_v5 = vld [vmem:[%s2200_s3 + $0x6b8] sm:$0xff]  ;;  %v559_v8 = vld [vmem:[%s2200_s3 + $0x670] sm:$0xff] }
 0x22d   : > { %907 = vmatpush.msrb.mxu1 %v414_v9  ;;  %853 = vmatpush.msra.mxu2 %v381_v21  ;;  %v432_v9 = vld [vmem:[%s2200_s3 + $0x278] sm:$0xff]  ;;  %v423_v1 = vld [vmem:[%s2200_s3 + $0x230] sm:$0xff] }
 0x22e   : > { %634 = vmatmul.f32.gmra.mxu2 %v1808_v61  ;;  %663 = vmatmul.f32.gmra.mxu3 %v1811_v62  ;;  %v415_v14 = vld [vmem:[%s2200_s3 + $0x1f0] sm:$0xff] }
 0x22f   : > { %692 = vmatmul.f32.gmra.mxu1 %v1808_v61  ;;  %721 = vmatmul.f32.gmra.mxu0 %v1811_v62  ;;  %v407_v47 = vld [vmem:[%s2200_s3 + $0x1b0] sm:$0xff] }
 0x230   : > { %936 = vmatpush.msrb.mxu0 %v542_v0  ;;  %879 = vmatpush.msra.mxu3 %v533_v11  ;;  %v560_v0 = vld [vmem:[%s2200_s3 + $0x678] sm:$0xff]  ;;  %v551_v11 = vld [vmem:[%s2200_s3 + $0x630] sm:$0xff] }
 0x231   : > { %908 = vmatpush.msrb.mxu1 %v406_v12  ;;  %854 = vmatpush.msra.mxu2 %v373_v25  ;;  %v424_v12 = vld [vmem:[%s2200_s3 + $0x238] sm:$0xff]  ;;  %v399_v21 = vld [vmem:[%s2200_s3 + $0x170] sm:$0xff] }
 0x232   : > { %937 = vmatpush.msrb.mxu0 %v534_v13  ;;  %880 = vmatpush.msra.mxu3 %v525_v15  ;;  %v552_v13 = vld [vmem:[%s2200_s3 + $0x638] sm:$0xff]  ;;  %v543_v15 = vld [vmem:[%s2200_s3 + $0x5f0] sm:$0xff] }
 0x233   : > { %909 = vmatpush.msrb.mxu1 %v398_v16  ;;  %855 = vmatpush.msra.mxu2 %v365_v29  ;;  %v416_v16 = vld [vmem:[%s2200_s3 + $0x1f8] sm:$0xff]  ;;  %v391_v25 = vld [vmem:[%s2200_s3 + $0x130] sm:$0xff] }
 0x234   : > { %938 = vmatpush.msrb.mxu0 %v526_v17  ;;  %881 = vmatpush.msra.mxu3 %v517_v18  ;;  %v544_v17 = vld [vmem:[%s2200_s3 + $0x5f8] sm:$0xff]  ;;  %v535_v18 = vld [vmem:[%s2200_s3 + $0x5b0] sm:$0xff] }
 0x235   : > { %910 = vmatpush.msrb.mxu1 %v390_v19  ;;  %856 = vmatpush.msra.mxu2 %v357_v33  ;;  %v408_v19 = vld [vmem:[%s2200_s3 + $0x1b8] sm:$0xff]  ;;  %v383_v29 = vld [vmem:[%s2200_s3 + $0xf0] sm:$0xff] }
 0x236   : > { %741 = vmatmul.f32.vlgmr.msrb.gmra.mxu2 %v1625_v63  ;;  %770 = vmatmul.f32.vlgmr.msrb.gmra.mxu3 %v1628_v3  ;;  %v375_v33 = vld [vmem:[%s2200_s3 + $0xb0] sm:$0xff] }
 0x237   : > { %799 = vmatmul.f32.vlgmr.msra.gmra.mxu1 %v1625_v63  ;;  %828 = vmatmul.f32.vlgmr.msra.gmra.mxu0 %v1628_v3 }
 0x238   : > { %939 = vmatpush.msrb.mxu0 %v518_v20  ;;  %882 = vmatpush.msra.mxu3 %v509_v22  ;;  %v536_v20 = vld [vmem:[%s2200_s3 + $0x5b8] sm:$0xff]  ;;  %v527_v22 = vld [vmem:[%s2200_s3 + $0x570] sm:$0xff] }
 0x239   : > { %911 = vmatpush.msrb.mxu1 %v382_v23  ;;  %957 = vmatpush.msrb.mxu2 %v479_v6  ;;  %v400_v23 = vld [vmem:[%s2200_s3 + $0x178] sm:$0xff]  ;;  %v367_v6 = vld [vmem:[%s2200_s3 + $0x70] sm:$0xff] }
 0x23a   : > { %940 = vmatpush.msrb.mxu0 %v510_v24  ;;  %883 = vmatpush.msra.mxu3 %v501_v26  ;;  %v528_v24 = vld [vmem:[%s2200_s3 + $0x578] sm:$0xff]  ;;  %v519_v26 = vld [vmem:[%s2200_s3 + $0x530] sm:$0xff] }
 0x23b   : > { %912 = vmatpush.msrb.mxu1 %v374_v27  ;;  %958 = vmatpush.msrb.mxu2 %v471_v41  ;;  %v392_v27 = vld [vmem:[%s2200_s3 + $0x138] sm:$0xff]  ;;  %v359_v41 = vld [vmem:[%s2200_s3 + $0x30] sm:$0xff] }
 0x23c   : > { %941 = vmatpush.msrb.mxu0 %v502_v28  ;;  %884 = vmatpush.msra.mxu3 %v493_v30  ;;  %v520_v28 = vld [vmem:[%s2200_s3 + $0x538] sm:$0xff]  ;;  %v511_v30 = vld [vmem:[%s2200_s3 + $0x4f0] sm:$0xff] }
 0x23d   : > { %913 = vmatpush.msrb.mxu1 %v366_v31  ;;  %959 = vmatpush.msrb.mxu2 %v463_v45  ;;  %v384_v31 = vld [vmem:[%s2200_s3 + $0xf8] sm:$0xff] }
 0x23e   : > { %744 = vmatmul.f32.gmra.mxu2 %v1719_v35  ;;  %773 = vmatmul.f32.gmra.mxu3 %v1722_v36 }
 0x23f   : > { %802 = vmatmul.f32.gmra.mxu1 %v1719_v35  ;;  %831 = vmatmul.f32.gmra.mxu0 %v1722_v36 }
 0x240   : > { %942 = vmatpush.msrb.mxu0 %v494_v32  ;;  %885 = vmatpush.msra.mxu3 %v485_v34  ;;  %v512_v32 = vld [vmem:[%s2200_s3 + $0x4f8] sm:$0xff]  ;;  %v503_v34 = vld [vmem:[%s2200_s3 + $0x4b0] sm:$0xff] }
 0x241   : > { %914 = vmatpush.msrb.mxu1 %v358_v37  ;;  %960 = vmatpush.msrb.mxu2 %v455_v2  ;;  %v376_v37 = vld [vmem:[%s2200_s3 + $0xb8] sm:$0xff] }
 0x242   : > { %943 = vmatpush.msrb.mxu0 %v486_v38  ;;  %986 = vmatpush.msrb.mxu3 %v607_v7  ;;  %v504_v38 = vld [vmem:[%s2200_s3 + $0x4b8] sm:$0xff]  ;;  %v495_v7 = vld [vmem:[%s2200_s3 + $0x470] sm:$0xff] }
 0x243   : > { %1015 = vmatpush.msra.mxu1 %v480_v39  ;;  %961 = vmatpush.msrb.mxu2 %v447_v46  ;;  %v368_v39 = vld [vmem:[%s2200_s3 + $0x78] sm:$0xff] }
 0x244   : > { %1044 = vmatpush.msra.mxu0 %v608_v40  ;;  %987 = vmatpush.msrb.mxu3 %v599_v42  ;;  %v496_v40 = vld [vmem:[%s2200_s3 + $0x478] sm:$0xff]  ;;  %v487_v42 = vld [vmem:[%s2200_s3 + $0x430] sm:$0xff] }
 0x245   : > { %1016 = vmatpush.msra.mxu1 %v472_v43  ;;  %962 = vmatpush.msrb.mxu2 %v439_v58  ;;  %v360_v43 = vld [vmem:[%s2200_s3 + $0x38] sm:$0xff] }
 0x246   : > { %747 = vmatmul.f32.gmra.mxu2 %v1762_v49  ;;  %776 = vmatmul.f32.gmra.mxu3 %v1765_v50 }
 0x247   : > { %805 = vmatmul.f32.gmra.mxu1 %v1762_v49  ;;  %834 = vmatmul.f32.gmra.mxu0 %v1765_v50 }
 0x248   : > { %1045 = vmatpush.msra.mxu0 %v600_v44  ;;  %988 = vmatpush.msrb.mxu3 %v591_v48  ;;  %v488_v44 = vld [vmem:[%s2200_s3 + $0x438] sm:$0xff] }
 0x249   : > { %1017 = vmatpush.msra.mxu1 %v464_v51  ;;  %963 = vmatpush.msrb.mxu2 %v431_v10 }
 0x24a   : > { %1046 = vmatpush.msra.mxu0 %v592_v52  ;;  %989 = vmatpush.msrb.mxu3 %v583_v4 }
 0x24b   : > { %1018 = vmatpush.msra.mxu1 %v456_v53  ;;  %964 = vmatpush.msrb.mxu2 %v423_v1 }
 0x24c   : > { %1047 = vmatpush.msra.mxu0 %v584_v54  ;;  %990 = vmatpush.msrb.mxu3 %v575_v55 }
 0x24d   : > { %1019 = vmatpush.msra.mxu1 %v448_v56  ;;  %965 = vmatpush.msrb.mxu2 %v415_v14 }
 0x24e   : > { %750 = vmatmul.f32.gmra.mxu2 %v1808_v61  ;;  %779 = vmatmul.f32.gmra.mxu3 %v1811_v62 }
 0x24f   : > { %808 = vmatmul.f32.gmra.mxu1 %v1808_v61  ;;  %837 = vmatmul.f32.gmra.mxu0 %v1811_v62 }
 0x250   : > { %1048 = vmatpush.msra.mxu0 %v576_v57  ;;  %991 = vmatpush.msrb.mxu3 %v567_v59 }
 0x251   : > { %1020 = vmatpush.msra.mxu1 %v440_v60  ;;  %966 = vmatpush.msrb.mxu2 %v407_v47 }
 0x252   : > { %1049 = vmatpush.msra.mxu0 %v568_v5  ;;  %992 = vmatpush.msrb.mxu3 %v559_v8 }
 0x253   : > { %1021 = vmatpush.msra.mxu1 %v432_v9  ;;  %967 = vmatpush.msrb.mxu2 %v399_v21 }
 0x254   : > { %1050 = vmatpush.msra.mxu0 %v560_v0  ;;  %993 = vmatpush.msrb.mxu3 %v551_v11 }
 0x255   : > { %1022 = vmatpush.msra.mxu1 %v424_v12  ;;  %968 = vmatpush.msrb.mxu2 %v391_v25 }
 0x256   : > { %857 = vmatmul.f32.vlgmr.msra.gmra.mxu2 %v1625_v63  ;;  %886 = vmatmul.f32.vlgmr.msra.gmra.mxu3 %v1628_v3 }
 0x257   : > { %915 = vmatmul.f32.vlgmr.msrb.gmra.mxu1 %v1625_v63  ;;  %944 = vmatmul.f32.vlgmr.msrb.gmra.mxu0 %v1628_v3 }
 0x258   : > { %1051 = vmatpush.msra.mxu0 %v552_v13  ;;  %994 = vmatpush.msrb.mxu3 %v543_v15 }
 0x259   : > { %1023 = vmatpush.msra.mxu1 %v416_v16  ;;  %969 = vmatpush.msrb.mxu2 %v383_v29 }
 0x25a   : > { %1052 = vmatpush.msra.mxu0 %v544_v17  ;;  %995 = vmatpush.msrb.mxu3 %v535_v18 }
 0x25b   : > { %1024 = vmatpush.msra.mxu1 %v408_v19  ;;  %970 = vmatpush.msrb.mxu2 %v375_v33 }
 0x25c   : > { %1053 = vmatpush.msra.mxu0 %v536_v20  ;;  %996 = vmatpush.msrb.mxu3 %v527_v22 }
 0x25d   : > { %1025 = vmatpush.msra.mxu1 %v400_v23  ;;  %971 = vmatpush.msrb.mxu2 %v367_v6 }
 0x25e   : > { %860 = vmatmul.f32.gmra.mxu2 %v1719_v35  ;;  %889 = vmatmul.f32.gmra.mxu3 %v1722_v36 }
 0x25f   : > { %918 = vmatmul.f32.gmra.mxu1 %v1719_v35  ;;  %947 = vmatmul.f32.gmra.mxu0 %v1722_v36 }
 0x260   : > { %1054 = vmatpush.msra.mxu0 %v528_v24  ;;  %997 = vmatpush.msrb.mxu3 %v519_v26 }
 0x261   : > { %1026 = vmatpush.msra.mxu1 %v392_v27  ;;  %972 = vmatpush.msrb.mxu2 %v359_v41 }
 0x262   : > { %1055 = vmatpush.msra.mxu0 %v520_v28  ;;  %998 = vmatpush.msrb.mxu3 %v511_v30 }
 0x263   : > { %1027 = vmatpush.msra.mxu1 %v384_v31 }
 0x264   : > { %1056 = vmatpush.msra.mxu0 %v512_v32  ;;  %999 = vmatpush.msrb.mxu3 %v503_v34 }
 0x265   : > { %1028 = vmatpush.msra.mxu1 %v376_v37 }
 0x266   : > { %863 = vmatmul.f32.gmra.mxu2 %v1762_v49  ;;  %892 = vmatmul.f32.gmra.mxu3 %v1765_v50 }
 0x267   : > { %921 = vmatmul.f32.gmra.mxu1 %v1762_v49  ;;  %950 = vmatmul.f32.gmra.mxu0 %v1765_v50 }
 0x268   : > { %1057 = vmatpush.msra.mxu0 %v504_v38  ;;  %1000 = vmatpush.msrb.mxu3 %v495_v7 }
 0x269   : > { %1029 = vmatpush.msra.mxu1 %v368_v39 }
 0x26a   : > { %1058 = vmatpush.msra.mxu0 %v496_v40  ;;  %1001 = vmatpush.msrb.mxu3 %v487_v42 }
 0x26b   : > { %1030 = vmatpush.msra.mxu1 %v360_v43 }
 0x26c   : > { %1059 = vmatpush.msra.mxu0 %v488_v44 }
 0x26e   : > { %866 = vmatmul.f32.gmra.mxu2 %v1808_v61  ;;  %895 = vmatmul.f32.gmra.mxu3 %v1811_v62 }
 0x26f   : > { %924 = vmatmul.f32.gmra.mxu1 %v1808_v61  ;;  %953 = vmatmul.f32.gmra.mxu0 %v1811_v62 }
 0x276   : > { %973 = vmatmul.f32.vlgmr.msrb.gmra.mxu2 %v1625_v63  ;;  %1002 = vmatmul.f32.vlgmr.msrb.gmra.mxu3 %v1628_v3 }
 0x277   : > { %1031 = vmatmul.f32.vlgmr.msra.gmra.mxu1 %v1625_v63  ;;  %1060 = vmatmul.f32.vlgmr.msra.gmra.mxu0 %v1628_v3 }
 0x27e   : > { %976 = vmatmul.f32.gmra.mxu2 %v1719_v35  ;;  %1005 = vmatmul.f32.gmra.mxu3 %v1722_v36 }
 0x27f   : > { %1034 = vmatmul.f32.gmra.mxu1 %v1719_v35  ;;  %1063 = vmatmul.f32.gmra.mxu0 %v1722_v36 }
 0x286   : > { %979 = vmatmul.f32.gmra.mxu2 %v1762_v49  ;;  %1008 = vmatmul.f32.gmra.mxu3 %v1765_v50 }
 0x287   : > { %1037 = vmatmul.f32.gmra.mxu1 %v1762_v49  ;;  %1066 = vmatmul.f32.gmra.mxu0 %v1765_v50 }
 0x28c   : > { %v684_v63 = vpop.f32.mrf.mxu1  ;;  %v713_v3 = vpop.f32.mrf.mxu0 }
 0x28d   : > { %v714_v35 = vadd.f32 %v713_v3, %v684_v63 }
 0x28e   : > { %982 = vmatmul.f32.gmra.mxu2 %v1808_v61  ;;  %1011 = vmatmul.f32.gmra.mxu3 %v1811_v62 }
 0x28f   : > { %1074 = vst [vmem:[%s2156_s18 + $0x8] sm:$0xff] %v714_v35  ;;  %1040 = vmatmul.f32.gmra.mxu1 %v1808_v61  ;;  %1069 = vmatmul.f32.gmra.mxu0 %v1811_v62 }
 0x291   : > { %v626_v36 = vpop.f32.mrf.mxu2  ;;  %v655_v49 = vpop.f32.mrf.mxu3 }
 0x292   : > { %v656_v50 = vadd.f32 %v655_v49, %v626_v36 }
 0x294   : > { %1073 = vst [vmem:[%s2156_s18] sm:$0xff] %v656_v50 }
 0x29c   : > { %v687_v45 = vpop.f32.mrf.mxu1  ;;  %v716_v48 = vpop.f32.mrf.mxu0 }
 0x29d   : > { %v717_v51 = vadd.f32 %v716_v48, %v687_v45 }
 0x29f   : > { %1082 = vst [vmem:[%s2156_s18 + $0x48] sm:$0xff] %v717_v51 }
 0x2a1   : > { %v629_v52 = vpop.f32.mrf.mxu2  ;;  %v658_v2 = vpop.f32.mrf.mxu3 }
 0x2a2   : > { %v659_v4 = vadd.f32 %v658_v2, %v629_v52 }
 0x2a4   : > { %1081 = vst [vmem:[%s2156_s18 + $0x40] sm:$0xff] %v659_v4  ;;  %v690_v53 = vpop.f32.mrf.mxu1  ;;  %v719_v61 = vpop.f32.mrf.mxu0 }
 0x2a5   : > { %v720_v54 = vadd.f32 %v719_v61, %v690_v53 }
 0x2a7   : > { %1090 = vst [vmem:[%s2156_s18 + $0x88] sm:$0xff] %v720_v54 }
 0x2a9   : > { %v632_v62 = vpop.f32.mrf.mxu2  ;;  %v661_v46 = vpop.f32.mrf.mxu3 }
 0x2aa   : > { %v662_v55 = vadd.f32 %v661_v46, %v632_v62 }
 0x2ac   : > { %1089 = vst [vmem:[%s2156_s18 + $0x80] sm:$0xff] %v662_v55  ;;  %v693_v56 = vpop.f32.mrf.mxu1  ;;  %v722_v57 = vpop.f32.mrf.mxu0 }
 0x2ad   : > { %v723_v58 = vadd.f32 %v722_v57, %v693_v56 }
 0x2af   : > { %1098 = vst [vmem:[%s2156_s18 + $0xc8] sm:$0xff] %v723_v58 }
 0x2b1   : > { %v635_v59 = vpop.f32.mrf.mxu2  ;;  %v664_v60 = vpop.f32.mrf.mxu3 }
 0x2b2   : > { %v665_v5 = vadd.f32 %v664_v60, %v635_v59 }
 0x2b4   : > { %1097 = vst [vmem:[%s2156_s18 + $0xc0] sm:$0xff] %v665_v5  ;;  %v800_v10 = vpop.f32.mrf.mxu1  ;;  %v829_v8 = vpop.f32.mrf.mxu0 }
 0x2b5   : > { %v830_v9 = vadd.f32 %v829_v8, %v800_v10 }
 0x2b7   : > { %1076 = vst [vmem:[%s2156_s18 + $0x18] sm:$0xff] %v830_v9 }
 0x2b9   : > { %v742_v0 = vpop.f32.mrf.mxu2  ;;  %v771_v1 = vpop.f32.mrf.mxu3 }
 0x2ba   : > { %v772_v11 = vadd.f32 %v771_v1, %v742_v0 }
 0x2bc   : > { %1075 = vst [vmem:[%s2156_s18 + $0x10] sm:$0xff] %v772_v11  ;;  %v803_v12 = vpop.f32.mrf.mxu1  ;;  %v832_v13 = vpop.f32.mrf.mxu0 }
 0x2bd   : > { %v833_v14 = vadd.f32 %v832_v13, %v803_v12 }
 0x2bf   : > { %1084 = vst [vmem:[%s2156_s18 + $0x58] sm:$0xff] %v833_v14 }
 0x2c1   : > { %v745_v15 = vpop.f32.mrf.mxu2  ;;  %v774_v16 = vpop.f32.mrf.mxu3 }
 0x2c2   : > { %v775_v17 = vadd.f32 %v774_v16, %v745_v15 }
 0x2c4   : > { %1083 = vst [vmem:[%s2156_s18 + $0x50] sm:$0xff] %v775_v17  ;;  %v806_v47 = vpop.f32.mrf.mxu1  ;;  %v835_v18 = vpop.f32.mrf.mxu0 }
 0x2c5   : > { %v836_v19 = vadd.f32 %v835_v18, %v806_v47 }
 0x2c7   : > { %1092 = vst [vmem:[%s2156_s18 + $0x98] sm:$0xff] %v836_v19 }
 0x2c9   : > { %v748_v20 = vpop.f32.mrf.mxu2  ;;  %v777_v21 = vpop.f32.mrf.mxu3 }
 0x2ca   : > { %v778_v22 = vadd.f32 %v777_v21, %v748_v20 }
 0x2cc   : > { %1091 = vst [vmem:[%s2156_s18 + $0x90] sm:$0xff] %v778_v22  ;;  %v809_v23 = vpop.f32.mrf.mxu1  ;;  %v838_v24 = vpop.f32.mrf.mxu0 }
 0x2cd   : > { %v839_v25 = vadd.f32 %v838_v24, %v809_v23 }
 0x2cf   : > { %1100 = vst [vmem:[%s2156_s18 + $0xd8] sm:$0xff] %v839_v25 }
 0x2d1   : > { %v751_v26 = vpop.f32.mrf.mxu2  ;;  %v780_v27 = vpop.f32.mrf.mxu3 }
 0x2d2   : > { %v781_v28 = vadd.f32 %v780_v27, %v751_v26 }
 0x2d4   : > { %1099 = vst [vmem:[%s2156_s18 + $0xd0] sm:$0xff] %v781_v28  ;;  %v916_v29 = vpop.f32.mrf.mxu1  ;;  %v945_v30 = vpop.f32.mrf.mxu0 }
 0x2d5   : > { %v946_v31 = vadd.f32 %v945_v30, %v916_v29 }
 0x2d7   : > { %1078 = vst [vmem:[%s2156_s18 + $0x28] sm:$0xff] %v946_v31 }
 0x2d9   : > { %v858_v32 = vpop.f32.mrf.mxu2  ;;  %v887_v33 = vpop.f32.mrf.mxu3 }
 0x2da   : > { %v888_v34 = vadd.f32 %v887_v33, %v858_v32 }
 0x2dc   : > { %1077 = vst [vmem:[%s2156_s18 + $0x20] sm:$0xff] %v888_v34  ;;  %v919_v37 = vpop.f32.mrf.mxu1  ;;  %v948_v38 = vpop.f32.mrf.mxu0 }
 0x2dd   : > { %v949_v6 = vadd.f32 %v948_v38, %v919_v37 }
 0x2df   : > { %1086 = vst [vmem:[%s2156_s18 + $0x68] sm:$0xff] %v949_v6 }
 0x2e1   : > { %v861_v7 = vpop.f32.mrf.mxu2  ;;  %v890_v39 = vpop.f32.mrf.mxu3 }
 0x2e2   : > { %v891_v40 = vadd.f32 %v890_v39, %v861_v7 }
 0x2e4   : > { %1085 = vst [vmem:[%s2156_s18 + $0x60] sm:$0xff] %v891_v40  ;;  %v922_v41 = vpop.f32.mrf.mxu1  ;;  %v951_v42 = vpop.f32.mrf.mxu0 }
 0x2e5   : > { %v952_v43 = vadd.f32 %v951_v42, %v922_v41 }
 0x2e7   : > { %1094 = vst [vmem:[%s2156_s18 + $0xa8] sm:$0xff] %v952_v43 }
 0x2e9   : > { %v864_v44 = vpop.f32.mrf.mxu2  ;;  %v893_v63 = vpop.f32.mrf.mxu3 }
 0x2ea   : > { %v894_v3 = vadd.f32 %v893_v63, %v864_v44 }
 0x2ec   : > { %1093 = vst [vmem:[%s2156_s18 + $0xa0] sm:$0xff] %v894_v3  ;;  %v925_v35 = vpop.f32.mrf.mxu1  ;;  %v954_v36 = vpop.f32.mrf.mxu0 }
 0x2ed   : > { %v955_v49 = vadd.f32 %v954_v36, %v925_v35 }
 0x2ef   : > { %1102 = vst [vmem:[%s2156_s18 + $0xe8] sm:$0xff] %v955_v49 }
 0x2f1   : > { %v867_v50 = vpop.f32.mrf.mxu2  ;;  %v896_v45 = vpop.f32.mrf.mxu3 }
 0x2f2   : > { %v897_v48 = vadd.f32 %v896_v45, %v867_v50 }
 0x2f4   : > { %1101 = vst [vmem:[%s2156_s18 + $0xe0] sm:$0xff] %v897_v48  ;;  %v1032_v51 = vpop.f32.mrf.mxu1  ;;  %v1061_v52 = vpop.f32.mrf.mxu0 }
 0x2f5   : > { %v1062_v2 = vadd.f32 %v1061_v52, %v1032_v51 }
 0x2f7   : > { %1080 = vst [vmem:[%s2156_s18 + $0x38] sm:$0xff] %v1062_v2 }
 0x2f9   : > { %v974_v4 = vpop.f32.mrf.mxu2  ;;  %v1003_v53 = vpop.f32.mrf.mxu3 }
 0x2fa   : > { %v1004_v61 = vadd.f32 %v1003_v53, %v974_v4 }
 0x2fc   : > { %1079 = vst [vmem:[%s2156_s18 + $0x30] sm:$0xff] %v1004_v61  ;;  %v1035_v54 = vpop.f32.mrf.mxu1  ;;  %v1064_v62 = vpop.f32.mrf.mxu0 }
 0x2fd   : > { %v1065_v46 = vadd.f32 %v1064_v62, %v1035_v54 }
 0x2ff   : > { %1088 = vst [vmem:[%s2156_s18 + $0x78] sm:$0xff] %v1065_v46 }
 0x301   : > { %v977_v55 = vpop.f32.mrf.mxu2  ;;  %v1006_v56 = vpop.f32.mrf.mxu3 }
 0x302   : > { %v1007_v57 = vadd.f32 %v1006_v56, %v977_v55 }
 0x304   : > { %1087 = vst [vmem:[%s2156_s18 + $0x70] sm:$0xff] %v1007_v57  ;;  %v1038_v58 = vpop.f32.mrf.mxu1  ;;  %v1067_v59 = vpop.f32.mrf.mxu0 }
 0x305   : > { %v1068_v60 = vadd.f32 %v1067_v59, %v1038_v58 }
 0x307   : > { %1096 = vst [vmem:[%s2156_s18 + $0xb8] sm:$0xff] %v1068_v60 }
 0x309   : > { %v980_v5 = vpop.f32.mrf.mxu2  ;;  %v1009_v10 = vpop.f32.mrf.mxu3 }
 0x30a   : > { %v1010_v8 = vadd.f32 %v1009_v10, %v980_v5 }
 0x30c   : > { %1095 = vst [vmem:[%s2156_s18 + $0xb0] sm:$0xff] %v1010_v8  ;;  %v1041_v9 = vpop.f32.mrf.mxu1  ;;  %v1070_v0 = vpop.f32.mrf.mxu0 }
 0x30d   : > { %v1071_v1 = vadd.f32 %v1070_v0, %v1041_v9 }
 0x30f   : > { %1104 = vst [vmem:[%s2156_s18 + $0xf8] sm:$0xff] %v1071_v1 }
 0x311   : > { %v983_v11 = vpop.f32.mrf.mxu2  ;;  %v1012_v12 = vpop.f32.mrf.mxu3 }
 0x312   : > { %v1013_v13 = vadd.f32 %v1012_v12, %v983_v11 }
 0x314   : > { %1103 = vst [vmem:[%s2156_s18 + $0xf0] sm:$0xff] %v1013_v13 }
 0x315 PF: > { %s14_s15 = sadd.s32 1, %s1202_s15  }
 0x316   : > { %p11_p4 = scmp.ge.s32.totalorder %s14_s15, 4  }
 0x318   :  { %13 = sbr.rel (!%p11_p4) target bundleno = 1 (0x1), region = 66 }

</bundles_post_ra>
